<compile_context>
chip_gen: v7x
topology: tpu7x:2x2x1
jax: 0.10.0
libtpu: 0.0.40
codegen_flags: <defaults>
</compile_context>

<pallas_src>
import jax
import jax.numpy as jnp
from jax import lax
from jax.experimental import pallas as pl
from jax.experimental.pallas import tpu as pltpu


def _round_up(x, m):
    return ((x + m - 1) // m) * m


def rnn_kernel(x_ref, wih_ref, whh_ref, b_ref, fcw_ref, fcb_ref, out_ref,
               h_ref, xproj_ref):
    """One (batch tile, time chunk) grid step.

    x_ref:     (Tc, TB, H)  embedded inputs for this chunk (compute dtype).
    wih/whh:   (H, H)       transposed RNN weights (x @ W convention).
    b:         (1, H)       b_ih + b_hh (f32).
    fcw:       (H, Op)      transposed Linear weight (lane padded).   fcb: (1, Op).
    out:       (TB, Op)     written only on the last time chunk.
    h_ref:     (TB, H) f32  hidden-state carry across time chunks (VMEM scratch).
    xproj_ref: (Tc*TB, H)   f32 scratch holding the hoisted input projection.
    """
    Tc, TB, H = x_ref.shape
    tc = pl.program_id(1)

    @pl.when(tc == 0)
    def _init():
        h_ref[...] = jnp.zeros_like(h_ref)  # h0 = zeros (matches torch.zeros(...))

    # Hoisted input projection: ONE (Tc*TB, H) x (H, H) MXU launch, bias folded once.
    x2d = x_ref[...].reshape(Tc * TB, H)
    xproj_ref[...] = (
        jnp.dot(x2d, wih_ref[...], preferred_element_type=jnp.float32) + b_ref[...]
    )

    whh = whh_ref[...]

    # Serial recurrence: only one small matmul + tanh per step remains on the chain.
    # fori_loop (unrolled for short chunks) bounds vreg live ranges while the pipeline
    # prefetches the next (Tc, TB, H) input chunk behind this compute.
    def step(t, h):
        xp = xproj_ref[pl.ds(t * TB, TB), :]
        hw = jnp.dot(h.astype(whh.dtype), whh, preferred_element_type=jnp.float32)
        return jnp.tanh(xp + hw)

    h_ref[...] = lax.fori_loop(0, Tc, step, h_ref[...],
                               unroll=True if Tc <= 8 else 8)

    # fc applied to the last timestep's hidden state only (out[:, -1, :]).
    @pl.when(tc == pl.num_programs(1) - 1)
    def _finalize():
        out_ref[...] = (
            jnp.dot(h_ref[...].astype(fcw_ref.dtype), fcw_ref[...],
                    preferred_element_type=jnp.float32)
            + fcb_ref[...]
        )


def transaction_rnn_forward(x_ids, params, *, compute_dtype=jnp.float32):
    """x_ids: (B, T) int32 token ids.  Returns (B, output_size) float32."""
    emb, w_ih, w_hh, b, fc_w, fc_b = params
    B, T = x_ids.shape
    V, H = emb.shape
    O = fc_w.shape[1]

    # --- padded sizes: lane-dense features, 8-aligned batch, big batch tiles.
    Hp = _round_up(H, 128)                   # lane-dense hidden dim (zero pad is exact)
    Op = _round_up(O, 128)                   # lane-dense output -> unmasked final vst
    TB = min(128, _round_up(max(B, 1), 8))   # up to 128 rows / MXU launch (raise to 256
                                             # on v6e/v7x when the batch allows; keep
                                             # Bp//TB even on v7x so both TCs get work)
    Bp = _round_up(B, TB)
    # Time-chunk size: largest "nice" divisor of T; bounds VMEM independent of T.
    Tc = 1
    for d in (64, 32, 16, 8, 4, 2, 1):
        if T % d == 0:
            Tc = d
            break

    dsize = jnp.dtype(compute_dtype).itemsize

    # --- zero padding (numerically exact: tanh(0)=0, zero rows/cols add nothing).
    emb_p = jnp.pad(emb, ((0, 0), (0, Hp - H)))
    w_ih_p = jnp.pad(w_ih, ((0, Hp - H), (0, Hp - H))).astype(compute_dtype)
    w_hh_p = jnp.pad(w_hh, ((0, Hp - H), (0, Hp - H))).astype(compute_dtype)
    b_p = jnp.pad(b, ((0, 0), (0, Hp - H)))                         # keep f32
    fc_w_p = jnp.pad(fc_w, ((0, Hp - H), (0, Op - O))).astype(compute_dtype)
    fc_b_p = jnp.pad(fc_b, ((0, 0), (0, Op - O)))                   # keep f32

    # Embedding lookup is pure indexing glue: gather in the wrapper, hand the kernel
    # time-major (T, Bp, Hp) embedded inputs (pad batch rows use token 0, sliced off).
    x_ids_p = jnp.pad(x_ids, ((0, Bp - B), (0, 0)))
    x_emb = jnp.transpose(emb_p[x_ids_p], (1, 0, 2)).astype(compute_dtype)  # (T,Bp,Hp)

    # --- explicit VMEM budget (double-buffered streams + scratch), with headroom.
    vmem_need = (
        2 * Tc * TB * Hp * dsize              # x chunk (double buffered)
        + 2 * 2 * Hp * Hp * dsize             # w_ih, w_hh (constant-index; still 2x
                                              #  buffered -> pl.Buffered(1) at prod H)
        + 2 * Hp * Op * dsize                 # fc_w
        + 2 * 8 * Hp * 4 + 2 * 8 * Op * 4     # biases (sublane-padded)
        + 2 * TB * Op * 4                     # output tile
        + Tc * TB * Hp * 4 + TB * Hp * 4      # xproj + h scratch
    )
    vmem_limit = int(min(max(2 * vmem_need, 32 * 1024 * 1024), 48 * 1024 * 1024))

    grid = (Bp // TB, T // Tc)  # batch tiles ("parallel"), time chunks ("arbitrary")

    out = pl.pallas_call(
        rnn_kernel,
        out_shape=jax.ShapeDtypeStruct((Bp, Op), jnp.float32),
        grid=grid,
        in_specs=[
            pl.BlockSpec((Tc, TB, Hp), lambda i, t: (t, i, 0)),  # streamed input chunk
            pl.BlockSpec((Hp, Hp), lambda i, t: (0, 0)),         # w_ih (replicated)
            pl.BlockSpec((Hp, Hp), lambda i, t: (0, 0)),         # w_hh (replicated)
            pl.BlockSpec((1, Hp), lambda i, t: (0, 0)),          # bias
            pl.BlockSpec((Hp, Op), lambda i, t: (0, 0)),         # fc weight
            pl.BlockSpec((1, Op), lambda i, t: (0, 0)),          # fc bias
        ],
        out_specs=pl.BlockSpec((TB, Op), lambda i, t: (i, 0)),
        scratch_shapes=[
            pltpu.VMEM((TB, Hp), jnp.float32),       # hidden-state carry across chunks
            pltpu.VMEM((Tc * TB, Hp), jnp.float32),  # per-chunk input projection
        ],
        compiler_params=pltpu.CompilerParams(
            dimension_semantics=("parallel", "arbitrary"),
            vmem_limit_bytes=vmem_limit,
        ),
    )(x_emb, w_ih_p, w_hh_p, b_p, fc_w_p, fc_b_p)

    return out[:B, :O]


def init_params(key, input_size, hidden_size, output_size):
    """Deterministic synthetic params matching nn.Embedding / nn.RNN / nn.Linear shapes.
    NOTE: real PyTorch weights (W@x / (O,H) layout) must be transposed to this x@W form."""
    k_emb, k_ih, k_hh, k_bih, k_bhh, k_fw, k_fb = jax.random.split(key, 7)
    s = 1.0 / jnp.sqrt(hidden_size)
    emb = jax.random.normal(k_emb, (input_size, hidden_size), jnp.float32)         # (V, H)
    w_ih = jax.random.uniform(k_ih, (hidden_size, hidden_size), jnp.float32, -s, s)
    w_hh = jax.random.uniform(k_hh, (hidden_size, hidden_size), jnp.float32, -s, s)
    b_ih = jax.random.uniform(k_bih, (hidden_size,), jnp.float32, -s, s)
    b_hh = jax.random.uniform(k_bhh, (hidden_size,), jnp.float32, -s, s)
    b = (b_ih + b_hh)[None, :]                                                      # (1, H)
    fc_w = jax.random.uniform(k_fw, (hidden_size, output_size), jnp.float32, -s, s)
    fc_b = jax.random.uniform(k_fb, (output_size,), jnp.float32, -s, s)[None, :]    # (1, O)
    return emb, w_ih, w_hh, b, fc_w, fc_b


def reference_forward(x_ids, params):
    """Pure-JAX reference reproducing the PyTorch forward exactly."""
    emb, w_ih, w_hh, b, fc_w, fc_b = params
    x = emb[x_ids]                                    # (B, T, H) embedding lookup
    B, T, H = x.shape
    h = jnp.zeros((B, H), jnp.float32)
    for t in range(T):
        h = jnp.tanh(x[:, t, :] @ w_ih + h @ w_hh + b)
    return h @ fc_w + fc_b                            # fc(out[:, -1, :])


if __name__ == "__main__":
    input_size = 16    # vocab size
    hidden_size = 32
    output_size = 4
    B, T = 2, 8

    key = jax.random.PRNGKey(0)
    k_params, k_x = jax.random.split(key)
    params = init_params(k_params, input_size, hidden_size, output_size)
    x_ids = jax.random.randint(k_x, (B, T), 0, input_size, dtype=jnp.int32)

    ref = reference_forward(x_ids, params)

    # Exact f32 path (meets the 1e-5 tolerance).
    out = jax.block_until_ready(transaction_rnn_forward(x_ids, params))
    assert out.shape == (B, output_size)
    assert jnp.allclose(out, ref, atol=1e-5, rtol=1e-5), (out, ref)

    # bf16 inputs/weights with f32 accumulation (halves HBM traffic / doubles MXU
    # throughput at production shapes); looser tolerance by construction.
    out_bf16 = jax.block_until_ready(
        transaction_rnn_forward(x_ids, params, compute_dtype=jnp.bfloat16))
    assert jnp.allclose(out_bf16, ref, atol=5e-2, rtol=5e-2), (out_bf16, ref)

    print("KERNEL_OK")
</pallas_src>

<mosaic_0001>
module attributes {stable_mosaic.version = 11 : i64} {
  func.func @rnn_kernel(%arg0: i32, %arg1: i32, %arg2: memref<8x8x128xf32, #tpu.memory_space<vmem>>, %arg3: memref<128x128xf32, #tpu.memory_space<vmem>>, %arg4: memref<128x128xf32, #tpu.memory_space<vmem>>, %arg5: memref<1x128xf32, #tpu.memory_space<vmem>>, %arg6: memref<128x128xf32, #tpu.memory_space<vmem>>, %arg7: memref<1x128xf32, #tpu.memory_space<vmem>>, %arg8: memref<8x128xf32, #tpu.memory_space<vmem>>, %arg9: memref<8x128xf32, #tpu.memory_space<vmem>>, %arg10: memref<64x128xf32, #tpu.memory_space<vmem>>) attributes {dimension_semantics = [#tpu.dimension_semantics<parallel>, #tpu.dimension_semantics<arbitrary>], iteration_bounds = array<i64: 1, 1>, scalar_prefetch = 0 : i64, scratch_operands = 2 : i64, tpu.core_type = #tpu.core_type<tc>, window_params = [{transform_indices = @transform_0, window_bounds = array<i64: 8, 8, 128>}, {pipeline_mode = #tpu.pipeline_mode<synchronous>, transform_indices = @transform_1, window_bounds = array<i64: 128, 128>}, {pipeline_mode = #tpu.pipeline_mode<synchronous>, transform_indices = @transform_2, window_bounds = array<i64: 128, 128>}, {pipeline_mode = #tpu.pipeline_mode<synchronous>, transform_indices = @transform_3, window_bounds = array<i64: 1, 128>}, {pipeline_mode = #tpu.pipeline_mode<synchronous>, transform_indices = @transform_4, window_bounds = array<i64: 128, 128>}, {pipeline_mode = #tpu.pipeline_mode<synchronous>, transform_indices = @transform_5, window_bounds = array<i64: 1, 128>}, {transform_indices = @transform_6, window_bounds = array<i64: 8, 128>}]} {
    %c0_i32 = arith.constant 0 : i32
    %0 = arith.cmpi eq, %arg1, %c0_i32 : i32
    %1 = arith.extui %0 : i1 to i32
    %c0_i32_0 = arith.constant 0 : i32
    %2 = arith.cmpi ne, %1, %c0_i32_0 : i32
    scf.if %2 {
      %cst_42 = arith.constant 0.000000e+00 : f32
      %65 = vector.broadcast %cst_42 : f32 to vector<8x128xf32>
      %c0_43 = arith.constant 0 : index
      %c0_44 = arith.constant 0 : index
      %66 = vector.load %arg9[%c0_43, %c0_44] : memref<8x128xf32, #tpu.memory_space<vmem>>, vector<8x128xf32>
      tpu.vector_store %arg9[%c0_43, %c0_44], %65 {strides = array<i32>} : memref<8x128xf32, #tpu.memory_space<vmem>>, vector<8x128xf32>,
    } else {
    }
    %c0 = arith.constant 0 : index
    %c0_1 = arith.constant 0 : index
    %c0_2 = arith.constant 0 : index
    %3 = vector.load %arg2[%c0, %c0_1, %c0_2] : memref<8x8x128xf32, #tpu.memory_space<vmem>>, vector<8x8x128xf32>
    %4 = vector.shape_cast %3 : vector<8x8x128xf32> to vector<64x128xf32>
    %c0_3 = arith.constant 0 : index
    %c0_4 = arith.constant 0 : index
    %5 = vector.load %arg3[%c0_3, %c0_4] : memref<128x128xf32, #tpu.memory_space<vmem>>, vector<128x128xf32>
    %cst = arith.constant dense<0.000000e+00> : vector<64x128xf32>
    %6 = tpu.matmul %4, %5, %cst {dimension_numbers = #tpu.dot_dimension_numbers<[1], [0], [0], [1], [0, 0, 1, 1], [], []>} : vector<64x128xf32>, vector<128x128xf32>, vector<64x128xf32> -> vector<64x128xf32>
    %c0_5 = arith.constant 0 : index
    %c0_6 = arith.constant 0 : index
    %7 = vector.load %arg5[%c0_5, %c0_6] : memref<1x128xf32, #tpu.memory_space<vmem>>, vector<1x128xf32>
    %8 = vector.broadcast %7 : vector<1x128xf32> to vector<64x128xf32>
    %9 = arith.addf %6, %8 : vector<64x128xf32>
    %c0_7 = arith.constant 0 : index
    %c0_8 = arith.constant 0 : index
    %10 = vector.load %arg10[%c0_7, %c0_8] : memref<64x128xf32, #tpu.memory_space<vmem>>, vector<64x128xf32>
    tpu.vector_store %arg10[%c0_7, %c0_8], %9 {strides = array<i32>} : memref<64x128xf32, #tpu.memory_space<vmem>>, vector<64x128xf32>,
    %c0_9 = arith.constant 0 : index
    %c0_10 = arith.constant 0 : index
    %11 = vector.load %arg4[%c0_9, %c0_10] : memref<128x128xf32, #tpu.memory_space<vmem>>, vector<128x128xf32>
    %c0_11 = arith.constant 0 : index
    %c0_12 = arith.constant 0 : index
    %12 = vector.load %arg9[%c0_11, %c0_12] : memref<8x128xf32, #tpu.memory_space<vmem>>, vector<8x128xf32>
    %c0_i32_13 = arith.constant 0 : i32
    %c8_i32 = arith.constant 8 : i32
    %13 = arith.muli %c0_i32_13, %c8_i32 : i32
    %14 = arith.index_cast %13 : i32 to index
    %c0_14 = arith.constant 0 : index
    %15 = vector.load %arg10[%14, %c0_14] : memref<64x128xf32, #tpu.memory_space<vmem>>, vector<8x128xf32>
    %cst_15 = arith.constant dense<0.000000e+00> : vector<8x128xf32>
    %16 = tpu.matmul %12, %11, %cst_15 {dimension_numbers = #tpu.dot_dimension_numbers<[1], [0], [0], [1], [0, 0, 1, 1], [], []>} : vector<8x128xf32>, vector<128x128xf32>, vector<8x128xf32> -> vector<8x128xf32>
    %17 = arith.addf %15, %16 : vector<8x128xf32>
    %18 = math.tanh %17 : vector<8x128xf32>
    %c1_i32 = arith.constant 1 : i32
    %c8_i32_16 = arith.constant 8 : i32
    %19 = arith.muli %c1_i32, %c8_i32_16 : i32
    %20 = arith.index_cast %19 : i32 to index
    %c0_17 = arith.constant 0 : index
    %21 = vector.load %arg10[%20, %c0_17] : memref<64x128xf32, #tpu.memory_space<vmem>>, vector<8x128xf32>
    %cst_18 = arith.constant dense<0.000000e+00> : vector<8x128xf32>
    %22 = tpu.matmul %18, %11, %cst_18 {dimension_numbers = #tpu.dot_dimension_numbers<[1], [0], [0], [1], [0, 0, 1, 1], [], []>} : vector<8x128xf32>, vector<128x128xf32>, vector<8x128xf32> -> vector<8x128xf32>
    %23 = arith.addf %21, %22 : vector<8x128xf32>
    %24 = math.tanh %23 : vector<8x128xf32>
    %c2_i32 = arith.constant 2 : i32
    %c8_i32_19 = arith.constant 8 : i32
    %25 = arith.muli %c2_i32, %c8_i32_19 : i32
    %26 = arith.index_cast %25 : i32 to index
    %c0_20 = arith.constant 0 : index
    %27 = vector.load %arg10[%26, %c0_20] : memref<64x128xf32, #tpu.memory_space<vmem>>, vector<8x128xf32>
    %cst_21 = arith.constant dense<0.000000e+00> : vector<8x128xf32>
    %28 = tpu.matmul %24, %11, %cst_21 {dimension_numbers = #tpu.dot_dimension_numbers<[1], [0], [0], [1], [0, 0, 1, 1], [], []>} : vector<8x128xf32>, vector<128x128xf32>, vector<8x128xf32> -> vector<8x128xf32>
    %29 = arith.addf %27, %28 : vector<8x128xf32>
    %30 = math.tanh %29 : vector<8x128xf32>
    %c3_i32 = arith.constant 3 : i32
    %c8_i32_22 = arith.constant 8 : i32
    %31 = arith.muli %c3_i32, %c8_i32_22 : i32
    %32 = arith.index_cast %31 : i32 to index
    %c0_23 = arith.constant 0 : index
    %33 = vector.load %arg10[%32, %c0_23] : memref<64x128xf32, #tpu.memory_space<vmem>>, vector<8x128xf32>
    %cst_24 = arith.constant dense<0.000000e+00> : vector<8x128xf32>
    %34 = tpu.matmul %30, %11, %cst_24 {dimension_numbers = #tpu.dot_dimension_numbers<[1], [0], [0], [1], [0, 0, 1, 1], [], []>} : vector<8x128xf32>, vector<128x128xf32>, vector<8x128xf32> -> vector<8x128xf32>
    %35 = arith.addf %33, %34 : vector<8x128xf32>
    %36 = math.tanh %35 : vector<8x128xf32>
    %c4_i32 = arith.constant 4 : i32
    %c8_i32_25 = arith.constant 8 : i32
    %37 = arith.muli %c4_i32, %c8_i32_25 : i32
    %38 = arith.index_cast %37 : i32 to index
    %c0_26 = arith.constant 0 : index
    %39 = vector.load %arg10[%38, %c0_26] : memref<64x128xf32, #tpu.memory_space<vmem>>, vector<8x128xf32>
    %cst_27 = arith.constant dense<0.000000e+00> : vector<8x128xf32>
    %40 = tpu.matmul %36, %11, %cst_27 {dimension_numbers = #tpu.dot_dimension_numbers<[1], [0], [0], [1], [0, 0, 1, 1], [], []>} : vector<8x128xf32>, vector<128x128xf32>, vector<8x128xf32> -> vector<8x128xf32>
    %41 = arith.addf %39, %40 : vector<8x128xf32>
    %42 = math.tanh %41 : vector<8x128xf32>
    %c5_i32 = arith.constant 5 : i32
    %c8_i32_28 = arith.constant 8 : i32
    %43 = arith.muli %c5_i32, %c8_i32_28 : i32
    %44 = arith.index_cast %43 : i32 to index
    %c0_29 = arith.constant 0 : index
    %45 = vector.load %arg10[%44, %c0_29] : memref<64x128xf32, #tpu.memory_space<vmem>>, vector<8x128xf32>
    %cst_30 = arith.constant dense<0.000000e+00> : vector<8x128xf32>
    %46 = tpu.matmul %42, %11, %cst_30 {dimension_numbers = #tpu.dot_dimension_numbers<[1], [0], [0], [1], [0, 0, 1, 1], [], []>} : vector<8x128xf32>, vector<128x128xf32>, vector<8x128xf32> -> vector<8x128xf32>
    %47 = arith.addf %45, %46 : vector<8x128xf32>
    %48 = math.tanh %47 : vector<8x128xf32>
    %c6_i32 = arith.constant 6 : i32
    %c8_i32_31 = arith.constant 8 : i32
    %49 = arith.muli %c6_i32, %c8_i32_31 : i32
    %50 = arith.index_cast %49 : i32 to index
    %c0_32 = arith.constant 0 : index
    %51 = vector.load %arg10[%50, %c0_32] : memref<64x128xf32, #tpu.memory_space<vmem>>, vector<8x128xf32>
    %cst_33 = arith.constant dense<0.000000e+00> : vector<8x128xf32>
    %52 = tpu.matmul %48, %11, %cst_33 {dimension_numbers = #tpu.dot_dimension_numbers<[1], [0], [0], [1], [0, 0, 1, 1], [], []>} : vector<8x128xf32>, vector<128x128xf32>, vector<8x128xf32> -> vector<8x128xf32>
    %53 = arith.addf %51, %52 : vector<8x128xf32>
    %54 = math.tanh %53 : vector<8x128xf32>
    %c7_i32 = arith.constant 7 : i32
    %c8_i32_34 = arith.constant 8 : i32
    %55 = arith.muli %c7_i32, %c8_i32_34 : i32
    %56 = arith.index_cast %55 : i32 to index
    %c0_35 = arith.constant 0 : index
    %57 = vector.load %arg10[%56, %c0_35] : memref<64x128xf32, #tpu.memory_space<vmem>>, vector<8x128xf32>
    %cst_36 = arith.constant dense<0.000000e+00> : vector<8x128xf32>
    %58 = tpu.matmul %54, %11, %cst_36 {dimension_numbers = #tpu.dot_dimension_numbers<[1], [0], [0], [1], [0, 0, 1, 1], [], []>} : vector<8x128xf32>, vector<128x128xf32>, vector<8x128xf32> -> vector<8x128xf32>
    %59 = arith.addf %57, %58 : vector<8x128xf32>
    %60 = math.tanh %59 : vector<8x128xf32>
    %c8_i32_37 = arith.constant 8 : i32
    %c0_38 = arith.constant 0 : index
    %c0_39 = arith.constant 0 : index
    %61 = vector.load %arg9[%c0_38, %c0_39] : memref<8x128xf32, #tpu.memory_space<vmem>>, vector<8x128xf32>
    tpu.vector_store %arg9[%c0_38, %c0_39], %60 {strides = array<i32>} : memref<8x128xf32, #tpu.memory_space<vmem>>, vector<8x128xf32>,
    %c0_i32_40 = arith.constant 0 : i32
    %62 = arith.cmpi eq, %arg1, %c0_i32_40 : i32
    %63 = arith.extui %62 : i1 to i32
    %c0_i32_41 = arith.constant 0 : i32
    %64 = arith.cmpi ne, %63, %c0_i32_41 : i32
    scf.if %64 {
      %c0_42 = arith.constant 0 : index
      %c0_43 = arith.constant 0 : index
      %65 = vector.load %arg9[%c0_42, %c0_43] : memref<8x128xf32, #tpu.memory_space<vmem>>, vector<8x128xf32>
      %c0_44 = arith.constant 0 : index
      %c0_45 = arith.constant 0 : index
      %66 = vector.load %arg6[%c0_44, %c0_45] : memref<128x128xf32, #tpu.memory_space<vmem>>, vector<128x128xf32>
      %cst_46 = arith.constant dense<0.000000e+00> : vector<8x128xf32>
      %67 = tpu.matmul %65, %66, %cst_46 {dimension_numbers = #tpu.dot_dimension_numbers<[1], [0], [0], [1], [0, 0, 1, 1], [], []>} : vector<8x128xf32>, vector<128x128xf32>, vector<8x128xf32> -> vector<8x128xf32>
      %c0_47 = arith.constant 0 : index
      %c0_48 = arith.constant 0 : index
      %68 = vector.load %arg7[%c0_47, %c0_48] : memref<1x128xf32, #tpu.memory_space<vmem>>, vector<1x128xf32>
      %69 = vector.broadcast %68 : vector<1x128xf32> to vector<8x128xf32>
      %70 = arith.addf %67, %69 : vector<8x128xf32>
      %c0_49 = arith.constant 0 : index
      %c0_50 = arith.constant 0 : index
      %71 = vector.load %arg8[%c0_49, %c0_50] : memref<8x128xf32, #tpu.memory_space<vmem>>, vector<8x128xf32>
      tpu.vector_store %arg8[%c0_49, %c0_50], %70 {strides = array<i32>} : memref<8x128xf32, #tpu.memory_space<vmem>>, vector<8x128xf32>,
    } else {
    }
    return
  }
  func.func @transform_0(%arg0: i32, %arg1: i32) -> (i32, i32, i32) {
    %c0_i32 = arith.constant 0 : i32
    %c0_i32_0 = arith.constant 0 : i32
    return %arg1, %arg0, %c0_i32 : i32, i32, i32
  }
  func.func @transform_1(%arg0: i32, %arg1: i32) -> (i32, i32) {
    %c0_i32 = arith.constant 0 : i32
    %c0_i32_0 = arith.constant 0 : i32
    %c0_i32_1 = arith.constant 0 : i32
    return %c0_i32, %c0_i32_0 : i32, i32
  }
  func.func @transform_2(%arg0: i32, %arg1: i32) -> (i32, i32) {
    %c0_i32 = arith.constant 0 : i32
    %c0_i32_0 = arith.constant 0 : i32
    %c0_i32_1 = arith.constant 0 : i32
    return %c0_i32, %c0_i32_0 : i32, i32
  }
  func.func @transform_3(%arg0: i32, %arg1: i32) -> (i32, i32) {
    %c0_i32 = arith.constant 0 : i32
    %c0_i32_0 = arith.constant 0 : i32
    %c0_i32_1 = arith.constant 0 : i32
    return %c0_i32, %c0_i32_0 : i32, i32
  }
  func.func @transform_4(%arg0: i32, %arg1: i32) -> (i32, i32) {
    %c0_i32 = arith.constant 0 : i32
    %c0_i32_0 = arith.constant 0 : i32
    %c0_i32_1 = arith.constant 0 : i32
    return %c0_i32, %c0_i32_0 : i32, i32
  }
  func.func @transform_5(%arg0: i32, %arg1: i32) -> (i32, i32) {
    %c0_i32 = arith.constant 0 : i32
    %c0_i32_0 = arith.constant 0 : i32
    %c0_i32_1 = arith.constant 0 : i32
    return %c0_i32, %c0_i32_0 : i32, i32
  }
  func.func @transform_6(%arg0: i32, %arg1: i32) -> (i32, i32) {
    %c0_i32 = arith.constant 0 : i32
    %c0_i32_0 = arith.constant 0 : i32
    return %arg0, %c0_i32 : i32, i32
  }
}

</mosaic_0001>

<bundles_post_ra>
// kernel: tpu_custom_call.1
= control target key start
LH: loop header
LB: loop body
LE: loop exit
PB: predicated region body
PF: predicated region fallthrough
CT: control target
= control target key end

     0   :  { %11 = vsyncpa [#allocation5], 0  ;;  %s2205_s0 = inlined_call_operand.hbm [shape: f32[8,8,128], index: 0, kind: input, shape index: {}]   ;;  %s2206_s1 = inlined_call_operand.hbm [shape: f32[128,128], index: 1, kind: input, shape index: {}]   ;;  %s2207_s2 = inlined_call_operand.hbm [shape: f32[128,128], index: 2, kind: input, shape index: {}]   ;;  %s2208_s3 = inlined_call_operand.vmem [shape: f32[1,128], index: 3, kind: input, shape index: {}]   ;;  %s2209_s4 = inlined_call_operand.hbm [shape: f32[128,128], index: 4, kind: input, shape index: {}]   ;;  %s2210_s5 = inlined_call_operand.vmem [shape: f32[1,128], index: 5, kind: input, shape index: {}]   ;;  %s2211_s6 = inlined_call_operand.hbm [shape: f32[8,128], index: 6, kind: output, shape index: {}]  }
   0x1   :  { %12 = vsyncpa [#allocation8], 0 }
   0x2   :  { %13 = vsyncpa [#allocation11], 0 }
   0x3   :  { %14 = vsyncpa [#allocation6], 0  ;;  %s1875_s21 = smov [#allocation7]   ;;  %s1876_s23 = smov [#allocation4]  }
   0x4   :  { %s32_s22 = sshll.u32 %s1875_s21, 4  ;;  %s20_s24 = sshll.u32 %s1876_s23, 4  ;;  %s33_s22 = int_to_ptr.vmem [resolvable:$true] %s32_s22  ;;  %s1920_s24 = int_to_ptr.vmem [resolvable:$true] %s20_s24 }
   0x5   :  { %s1757_s27 = scalar_lea.hbm %s2206_s1, 2048 }
   0x6   :  { %p1758_p0 = scmp.ne.s32.totalorder %s2206_s1, %s1757_s27  ;;  %p1761_p1 = scmp.lt.u32.totalorder %s1757_s27, %s2206_s1 }
   0x8   :  { %p1763_p2 = pnand %p1761_p1, %p1758_p0 }
   0xa   :  { %1766 = shalt.err (!%p1763_p2)
}
   0xb   :  { %s1767_s8 = scalar_lea.vmem %s33_s22, 2048  ;;  %p1772_p4 = scmp.lt.s32.totalorder %s33_s22, %s33_s22 }
   0xc   :  { %p1768_p3 = scmp.ne.s32.totalorder %s33_s22, %s1767_s8  ;;  %p1773_p5 = scmp.lt.s32.totalorder %s1767_s8, %s1767_s8 }
   0xe   :  { %p1774_p6 = por %p1773_p5, %p1772_p4 }
  0x10   :  { %p1775_p7 = pnand %p1774_p6, %p1768_p3 }
  0x12   :  { %1778 = shalt.err (!%p1775_p7)
}
  0x13   :  { %s1877_s9 = smov 128   ;;  %s1878_s10 = smov 8  }
  0x14   :  { %38 = dma.hbm_to_vmem [thread:$0]  %s2206_s1, 2048, %s33_s22, [#allocation8], %s1877_s9, %s1877_s9, %s1878_s10  }
  0x15   :  { %s1779_s15 = scalar_lea.hbm %s2205_s0, 1024 }
  0x16   :  { %p1780_p8 = scmp.ne.s32.totalorder %s2205_s0, %s1779_s15  ;;  %p1783_p9 = scmp.lt.u32.totalorder %s1779_s15, %s2205_s0 }
  0x18   :  { %p1785_p10 = pnand %p1783_p9, %p1780_p8 }
  0x1a   :  { %1788 = shalt.err (!%p1785_p10)
}
  0x1b   :  { %s1789_s20 = scalar_lea.vmem %s1920_s24, 1024  ;;  %p1794_p12 = scmp.lt.s32.totalorder %s1920_s24, %s1920_s24 }
  0x1c   :  { %p1790_p11 = scmp.ne.s32.totalorder %s1920_s24, %s1789_s20  ;;  %p1795_p13 = scmp.lt.s32.totalorder %s1789_s20, %s1789_s20 }
  0x1e   :  { %p1796_p0 = por %p1795_p13, %p1794_p12 }
  0x20   :  { %p1797_p1 = pnand %p1796_p0, %p1790_p11 }
  0x22   :  { %1800 = shalt.err (!%p1797_p1)
}
  0x23   :  { %26 = dma.hbm_to_vmem [thread:$0]  %s2205_s0, 1024, %s1920_s24, [#allocation5], %s1877_s9, %s1877_s9, %s1878_s10  }
  0x24   :  { %s1879_s22 = smov [#allocation9]   ;;  %s1880_s25 = smov [#allocation10]  }
  0x25   :  { %s44_s23 = sshll.u32 %s1879_s22, 4  ;;  %s58_s26 = sshll.u32 %s1880_s25, 4  ;;  %s45_s23 = int_to_ptr.vmem [resolvable:$true] %s44_s23  ;;  %s1957_s26 = int_to_ptr.vmem [resolvable:$true] %s58_s26 }
  0x26   :  { %s1801_s29 = scalar_lea.hbm %s2207_s2, 2048 }
  0x27   :  { %p1802_p2 = scmp.ne.s32.totalorder %s2207_s2, %s1801_s29  ;;  %p1805_p3 = scmp.lt.u32.totalorder %s1801_s29, %s2207_s2 }
  0x29   :  { %p1807_p4 = pnand %p1805_p3, %p1802_p2 }
  0x2b   :  { %1810 = shalt.err (!%p1807_p4)
}
  0x2c   :  { %s1811_s0 = scalar_lea.vmem %s45_s23, 2048  ;;  %p1816_p6 = scmp.lt.s32.totalorder %s45_s23, %s45_s23 }
  0x2d   :  { %p1812_p5 = scmp.ne.s32.totalorder %s45_s23, %s1811_s0  ;;  %p1817_p7 = scmp.lt.s32.totalorder %s1811_s0, %s1811_s0 }
  0x2f   :  { %p1818_p8 = por %p1817_p7, %p1816_p6 }
  0x31   :  { %p1819_p9 = pnand %p1818_p8, %p1812_p5 }
  0x33   :  { %1822 = shalt.err (!%p1819_p9)
}
  0x34   :  { %50 = dma.hbm_to_vmem [thread:$0]  %s2207_s2, 2048, %s45_s23, [#allocation8], %s1877_s9, %s1877_s9, %s1878_s10  }
  0x35   :  { %s1823_s15 = scalar_lea.hbm %s2209_s4, 2048 }
  0x36   :  { %p1824_p10 = scmp.ne.s32.totalorder %s2209_s4, %s1823_s15  ;;  %p1827_p11 = scmp.lt.u32.totalorder %s1823_s15, %s2209_s4 }
  0x38   :  { %p1829_p12 = pnand %p1827_p11, %p1824_p10 }
  0x3a   :  { %1832 = shalt.err (!%p1829_p12)
}
  0x3b   :  { %s1833_s20 = scalar_lea.vmem %s1957_s26, 2048  ;;  %p1838_p0 = scmp.lt.s32.totalorder %s1957_s26, %s1957_s26 }
  0x3c   :  { %p1834_p13 = scmp.ne.s32.totalorder %s1957_s26, %s1833_s20  ;;  %p1839_p1 = scmp.lt.s32.totalorder %s1833_s20, %s1833_s20 }
  0x3e   :  { %p1840_p2 = por %p1839_p1, %p1838_p0 }
  0x40   :  { %p1841_p3 = pnand %p1840_p2, %p1834_p13 }
  0x42   :  { %1844 = shalt.err (!%p1841_p3)
}
  0x43   :  { %64 = dma.hbm_to_vmem [thread:$0]  %s2209_s4, 2048, %s1957_s26, [#allocation11], %s1877_s9, %s1877_s9, %s1878_s10  }
  0x44   :  { %1867 = dma.done.wait [#allocation5], 1024  }
  0x45   :  { %1868 = vsyncadd [#allocation5], 4294966272 }
  0x46   :  { %1869 = dma.done.wait [#allocation8], 4096  }
  0x47   :  { %1870 = vsyncadd [#allocation8], 4294963200 }
  0x48   :  { %1871 = dma.done.wait [#allocation11], 2048  }
  0x49   :  { %1872 = vsyncadd [#allocation11], 4294965248  ;;  %v1881_v0 = vmov 0.0|0.0   ;;  %vm1882_vm0 = vmmov 0   ;;  %v1883_v1 = vmov 0.0   ;;  %v92_v2 = vld [vmem:[#allocation7] sm:$0xff] }
  0x4a   :  { %1515 = vmatprep.subr.bf16.mxu1 %v1881_v0  ;;  %1200 = vmatprep.mubr.msk.f32.mxu1 %vm1882_vm0, %v1883_v1  ;;  %v93_v3 = vld [vmem:[#allocation7 + $0x8] sm:$0xff]  ;;  %v228_v4 = vld [vmem:[#allocation9] sm:$0xff]  ;;  %v94_v7 = vld [vmem:[#allocation7 + $0x10] sm:$0xff]  ;;  %s1884_s21 = smov [#allocation12]  }
  0x4b   :  { %v1483_v5 = vpack.c.bf16 %v93_v3, %v92_v2  ;;  %v229_v6 = vld [vmem:[#allocation9 + $0x8] sm:$0xff]  ;;  %v95_v8 = vld [vmem:[#allocation7 + $0x18] sm:$0xff]  ;;  %v230_v11 = vld [vmem:[#allocation9 + $0x10] sm:$0xff]  ;;  %s934_s22 = sshll.u32 %s1884_s21, 4  ;;  %s935_s22 = int_to_ptr.vmem [resolvable:$true] %s934_s22 }
  0x4c   :  { %v1997_v9 = vpack.c.bf16 %v229_v6, %v228_v4  ;;  %v1487_v10 = vpack.c.bf16 %v95_v8, %v94_v7  ;;  %v231_v12 = vld [vmem:[#allocation9 + $0x18] sm:$0xff]  ;;  %v96_v13 = vld [vmem:[#allocation7 + $0x20] sm:$0xff]  ;;  %v97_v14 = vld [vmem:[#allocation7 + $0x28] sm:$0xff]  ;;  %s1845_s23 = scalar_lea.vmem %s935_s22, 128  ;;  %p1850_p5 = scmp.lt.s32.totalorder %s935_s22, %s935_s22 }
  0x4d   :  { %1484 = vmatprep.subr.bf16.mxu0 %v1483_v5  ;;  %v2000_v15 = vpack.c.bf16 %v231_v12, %v230_v11  ;;  %v1491_v16 = vpack.c.bf16 %v97_v14, %v96_v13  ;;  %v232_v17 = vld [vmem:[#allocation9 + $0x20] sm:$0xff]  ;;  %v233_v18 = vld [vmem:[#allocation9 + $0x28] sm:$0xff]  ;;  %v98_v19 = vld [vmem:[#allocation7 + $0x30] sm:$0xff]  ;;  %p1846_p4 = scmp.ne.s32.totalorder %s935_s22, %s1845_s23  ;;  %p1851_p6 = scmp.lt.s32.totalorder %s1845_s23, %s1845_s23 }
  0x4e   :  { %1486 = vmatpush3.bf16.msra.mxu0 %v1483_v5  ;;  %1517 = vmatpush3.bf16.msra.mxu1 %v1997_v9  ;;  %v99_v20 = vld [vmem:[#allocation7 + $0x38] sm:$0xff]  ;;  %v2004_v21 = vpack.c.bf16 %v233_v18, %v232_v17  ;;  %v234_v23 = vld [vmem:[#allocation9 + $0x30] sm:$0xff]  ;;  %v100_v25 = vld [vmem:[#allocation7 + $0x40] sm:$0xff] }
  0x4f   :  { %1488 = vmatprep.subr.bf16.mxu0 %v1487_v10  ;;  %1518 = vmatprep.subr.bf16.mxu1 %v1881_v0  ;;  %v1495_v22 = vpack.c.bf16 %v99_v20, %v98_v19  ;;  %v235_v24 = vld [vmem:[#allocation9 + $0x38] sm:$0xff]  ;;  %v101_v26 = vld [vmem:[#allocation7 + $0x48] sm:$0xff]  ;;  %v84_v27 = vld [vmem:[#allocation4] sm:$0xff]  ;;  %p1852_p7 = por %p1851_p6, %p1850_p5 }
  0x50   :  { %1156 = vmatprep.mubr.f32.mxu0 %v84_v27  ;;  %v2008_v28 = vpack.c.bf16 %v235_v24, %v234_v23  ;;  %v1499_v29 = vpack.c.bf16 %v101_v26, %v100_v25  ;;  %v236_v30 = vld [vmem:[#allocation9 + $0x40] sm:$0xff]  ;;  %v237_v31 = vld [vmem:[#allocation9 + $0x48] sm:$0xff]  ;;  %v102_v32 = vld [vmem:[#allocation7 + $0x50] sm:$0xff] }
  0x51   :  { %v103_v33 = vld [vmem:[#allocation7 + $0x58] sm:$0xff]  ;;  %v2012_v34 = vpack.c.bf16 %v237_v31, %v236_v30  ;;  %v238_v36 = vld [vmem:[#allocation9 + $0x50] sm:$0xff]  ;;  %v104_v38 = vld [vmem:[#allocation7 + $0x60] sm:$0xff]  ;;  %p1853_p8 = pnand %p1852_p7, %p1846_p4 }
  0x52   :  { %1490 = vmatpush3.bf16.msra.mxu0 %v1487_v10  ;;  %1520 = vmatpush3.bf16.msra.mxu1 %v2000_v15  ;;  %v1503_v35 = vpack.c.bf16 %v103_v33, %v102_v32  ;;  %v239_v37 = vld [vmem:[#allocation9 + $0x58] sm:$0xff]  ;;  %v105_v39 = vld [vmem:[#allocation7 + $0x68] sm:$0xff]  ;;  %v240_v42 = vld [vmem:[#allocation9 + $0x60] sm:$0xff] }
  0x53   :  { %1492 = vmatprep.subr.bf16.mxu0 %v1491_v16  ;;  %1521 = vmatprep.subr.bf16.mxu1 %v1881_v0  ;;  %v2016_v40 = vpack.c.bf16 %v239_v37, %v238_v36  ;;  %v1507_v41 = vpack.c.bf16 %v105_v39, %v104_v38  ;;  %v241_v43 = vld [vmem:[#allocation9 + $0x68] sm:$0xff]  ;;  %v106_v44 = vld [vmem:[#allocation7 + $0x70] sm:$0xff]  ;;  %v107_v45 = vld [vmem:[#allocation7 + $0x78] sm:$0xff] }
  0x54   :  { %v2020_v46 = vpack.c.bf16 %v241_v43, %v240_v42  ;;  %v1511_v47 = vpack.c.bf16 %v107_v45, %v106_v44  ;;  %v242_v48 = vld [vmem:[#allocation9 + $0x70] sm:$0xff]  ;;  %v243_v49 = vld [vmem:[#allocation9 + $0x78] sm:$0xff]  ;;  %v85_v51 = vld [vmem:[#allocation4 + $0x8] sm:$0xff] }
  0x55   :  { %v2024_v50 = vpack.c.bf16 %v243_v49, %v242_v48  ;;  %v86_v52 = vld [vmem:[#allocation4 + $0x10] sm:$0xff]  ;;  %v87_v53 = vld [vmem:[#allocation4 + $0x18] sm:$0xff]  ;;  %v88_v54 = vld [vmem:[#allocation4 + $0x20] sm:$0xff] }
  0x56   :  { %1494 = vmatpush3.bf16.msra.mxu0 %v1491_v16  ;;  %1523 = vmatpush3.bf16.msra.mxu1 %v2004_v21  ;;  %v89_v55 = vld [vmem:[#allocation4 + $0x28] sm:$0xff]  ;;  %v90_v56 = vld [vmem:[#allocation4 + $0x30] sm:$0xff]  ;;  %v91_v57 = vld [vmem:[#allocation4 + $0x38] sm:$0xff] }
  0x57   :  { %1496 = vmatprep.subr.bf16.mxu0 %v1495_v22  ;;  %1524 = vmatprep.subr.bf16.mxu1 %v1881_v0  ;;  %v2070_v58 = vld [vmem:[%s2208_s3] ss:$0 sm:$0xff]  ;;  %v835_v36 = vld [vmem:[#allocation10 + $0x8] sm:$0xff]  ;;  %v836_v37 = vld [vmem:[#allocation10 + $0x10] sm:$0xff] }
  0x58   :  { %v837_v39 = vld [vmem:[#allocation10 + $0x18] sm:$0xff]  ;;  %v839_v42 = vld [vmem:[#allocation10 + $0x28] sm:$0xff]  ;;  %v840_v44 = vld [vmem:[#allocation10 + $0x30] sm:$0xff] }
  0x59   :  { %v841_v45 = vld [vmem:[#allocation10 + $0x38] sm:$0xff] }
  0x5a   :  { %1498 = vmatpush3.bf16.msra.mxu0 %v1495_v22  ;;  %1526 = vmatpush3.bf16.msra.mxu1 %v2008_v28 }
  0x5b   :  { %1500 = vmatprep.subr.bf16.mxu0 %v1499_v29  ;;  %1527 = vmatprep.subr.bf16.mxu1 %v1881_v0 }
  0x5e   :  { %1502 = vmatpush3.bf16.msra.mxu0 %v1499_v29  ;;  %1529 = vmatpush3.bf16.msra.mxu1 %v2012_v34 }
  0x5f   :  { %1504 = vmatprep.subr.bf16.mxu0 %v1503_v35  ;;  %1530 = vmatprep.subr.bf16.mxu1 %v1881_v0 }
  0x62   :  { %1506 = vmatpush3.bf16.msra.mxu0 %v1503_v35  ;;  %1532 = vmatpush3.bf16.msra.mxu1 %v2016_v40  ;;  %v834_v35 = vld [vmem:[#allocation10] sm:$0xff] }
  0x63   :  { %1508 = vmatprep.subr.bf16.mxu0 %v1507_v41  ;;  %1533 = vmatprep.subr.bf16.mxu1 %v1881_v0  ;;  %v1708_v38 = vpack.c.bf16 %v835_v36, %v834_v35 }
  0x66   :  { %1510 = vmatpush3.bf16.msra.mxu0 %v1507_v41  ;;  %1535 = vmatpush3.bf16.msra.mxu1 %v2020_v46  ;;  %v838_v41 = vld [vmem:[#allocation10 + $0x20] sm:$0xff] }
  0x67   :  { %1512 = vmatprep.subr.bf16.mxu0 %v1511_v47  ;;  %1536 = vmatprep.subr.bf16.mxu1 %v1881_v0  ;;  %v1714_v43 = vpack.c.bf16 %v839_v42, %v838_v41 }
  0x6a   :  { %1514 = vmatpush3.bf16.msra.mxu0 %v1511_v47  ;;  %1538 = vmatpush3.bf16.msra.mxu1 %v2024_v50  ;;  %v843_v47 = vld [vmem:[#allocation10 + $0x48] sm:$0xff] }
  0x6b   :  { %1539 = vmatprep.subr.bf16.mxu0 %v1881_v0  ;;  %1563 = vmatprep.subr.bf16.mxu1 %v1881_v0 }
  0x6d   :  { %1157 = vmatmul.mubr.f32.vlgmr.msra.gmra.mrb[0].mxu0 %v85_v51  ;;  %1201 = vmatmul.mubr.f32.vlgmr.msra.gmra.mrb[0].mxu1 %v1883_v1 }
  0x6e   :  { %1541 = vmatpush3.bf16.msra.mxu0 %v1997_v9  ;;  %1565 = vmatpush3.bf16.msra.mxu1 %v1997_v9 }
  0x6f   :  { %1542 = vmatprep.subr.bf16.mxu0 %v1881_v0  ;;  %1566 = vmatprep.subr.bf16.mxu1 %v1881_v0 }
  0x70   :  { %1270 = vmatprep.mubr.msk.f32.mxu1 %vm1882_vm0, %v1883_v1  ;;  %1159 = vmatprep.mubr.f32.mxu0 %v86_v52 }
  0x71   :  { %1160 = vmatmul.mubr.f32.gmra.mrb[2].mxu0 %v87_v53 }
  0x72   :  { %1544 = vmatpush3.bf16.msra.mxu0 %v2000_v15  ;;  %1568 = vmatpush3.bf16.msra.mxu1 %v2000_v15 }
  0x73   :  { %1545 = vmatprep.subr.bf16.mxu0 %v1881_v0  ;;  %1569 = vmatprep.subr.bf16.mxu1 %v1881_v0 }
  0x74   :  { %1162 = vmatprep.mubr.f32.mxu0 %v88_v54  ;;  %v844_v54 = vld [vmem:[#allocation10 + $0x50] sm:$0xff] }
  0x75   :  { %1163 = vmatmul.mubr.f32.gmra.mrb[4].mxu0 %v89_v55  ;;  %v845_v55 = vld [vmem:[#allocation10 + $0x58] sm:$0xff] }
  0x76   :  { %1547 = vmatpush3.bf16.msra.mxu0 %v2004_v21  ;;  %1571 = vmatpush3.bf16.msra.mxu1 %v2004_v21 }
  0x77   :  { %1548 = vmatprep.subr.bf16.mxu0 %v1881_v0  ;;  %1572 = vmatprep.subr.bf16.mxu1 %v1881_v0 }
  0x78   :  { %1165 = vmatprep.mubr.f32.mxu0 %v90_v56  ;;  %v1723_v56 = vpack.c.bf16 %v845_v55, %v844_v54 }
  0x79   :  { %1166 = vmatmul.mubr.f32.gmra.mrb[6].mxu0 %v91_v57  ;;  %v846_v57 = vld [vmem:[#allocation10 + $0x60] sm:$0xff] }
  0x7a   :  { %1550 = vmatpush3.bf16.msra.mxu0 %v2008_v28  ;;  %1574 = vmatpush3.bf16.msra.mxu1 %v2008_v28 }
  0x7b   :  { %1551 = vmatprep.subr.bf16.mxu0 %v1881_v0  ;;  %1575 = vmatprep.subr.bf16.mxu1 %v1881_v0 }
  0x7c   :  { %1235 = vmatprep.mubr.msk.f32.mxu0 %vm1882_vm0, %v1883_v1 }
  0x7e   :  { %1553 = vmatpush3.bf16.msra.mxu0 %v2012_v34  ;;  %1577 = vmatpush3.bf16.msra.mxu1 %v2012_v34 }
  0x7f   :  { %1554 = vmatprep.subr.bf16.mxu0 %v1881_v0  ;;  %1578 = vmatprep.subr.bf16.mxu1 %v1881_v0 }
  0x82   :  { %1556 = vmatpush3.bf16.msra.mxu0 %v2016_v40  ;;  %1580 = vmatpush3.bf16.msra.mxu1 %v2016_v40 }
  0x83   :  { %1557 = vmatprep.subr.bf16.mxu0 %v1881_v0  ;;  %1581 = vmatprep.subr.bf16.mxu1 %v1881_v0 }
  0x86   :  { %1559 = vmatpush3.bf16.msra.mxu0 %v2020_v46  ;;  %1583 = vmatpush3.bf16.msra.mxu1 %v2020_v46 }
  0x87   :  { %1560 = vmatprep.subr.bf16.mxu0 %v1881_v0  ;;  %1584 = vmatprep.subr.bf16.mxu1 %v1881_v0 }
  0x8a   :  { %1562 = vmatpush3.bf16.msra.mxu0 %v2024_v50  ;;  %1586 = vmatpush3.bf16.msra.mxu1 %v2024_v50 }
  0x8b   :  { %1587 = vmatprep.subr.bf16.mxu0 %v1881_v0  ;;  %1611 = vmatprep.subr.bf16.mxu1 %v1881_v0 }
 0x140   :  { %v1158_v59 = vpop.f32.mrb[0].mxu0  ;;  %v312_v60 = vpop.f32.mrb[0].mxu1 }
 0x141   :  { %v181_v61 = vpop.f32.mrb[1].mxu0  ;;  %v1202_v62 = vpop.f32.mrb[1].mxu1  ;;  %v187_v11 = vadd.f32 %v1158_v59, %v2070_v58  ;;  %v847_v59 = vld [vmem:[#allocation10 + $0x68] sm:$0xff] }
 0x142   :  { %v182_v63 = vadd.f32 %v2070_v58, %v181_v61  ;;  %v848_v61 = vld [vmem:[#allocation10 + $0x70] sm:$0xff]  ;;  %v849_v62 = vld [vmem:[#allocation10 + $0x78] sm:$0xff] }
 0x144   :  { %v316_v2 = vadd.f32 %v312_v60, %v182_v63  ;;  %v1161_v4 = vpop.f32.mrb[2].mxu0  ;;  %v1726_v60 = vpack.c.bf16 %v847_v59, %v846_v57  ;;  %v1729_v63 = vpack.c.bf16 %v849_v62, %v848_v61 }
 0x145   :  { %v191_v5 = vpop.f32.mrb[3].mxu0  ;;  %v197_v23 = vadd.f32 %v1161_v4, %v2070_v58 }
 0x146   :  { %1741 = vtanh.f32 %v316_v2  ;;  %v192_v17 = vadd.f32 %v2070_v58, %v191_v5 }
 0x148   :  { %v2091_v6 = vpop.f32.mrb[4].mxu0 }
 0x149   :  { %v2093_v7 = vpop.f32.mrb[5].mxu0 }
 0x14a   :  { %v202_v29 = vadd.f32 %v2070_v58, %v2093_v7  ;;  %v946_v7 = vld [vmem:[%s2210_s5] ss:$0 sm:$0xff] }
 0x14c   :  { %v2095_v8 = vpop.f32.mrb[6].mxu0 }
 0x14d   :  { %v2097_v10 = vpop.f32.mrb[7].mxu0  ;;  %v217_v2 = vadd.f32 %v2095_v8, %v2070_v58 }
 0x14e   :  { %v212_v49 = vadd.f32 %v2070_v58, %v2097_v10 }
 0x150   :  { %v1742_v3 = vpop.eup %1741 }
 0x151   :  { %1236 = vmatmul.mubr.f32.vlgmr.msra.gmra.mrb[8].mxu0 %v1742_v3 }
 0x152   :  { %1589 = vmatpush3.bf16.msra.mxu0 %v1997_v9  ;;  %1305 = vmatprep.mubr.msk.f32.mxu0 %vm1882_vm0, %v1883_v1 }
 0x153   :  { %1590 = vmatprep.subr.bf16.mxu0 %v1881_v0 }
 0x156   :  { %1592 = vmatpush3.bf16.msra.mxu0 %v2000_v15 }
 0x157   :  { %1593 = vmatprep.subr.bf16.mxu0 %v1881_v0 }
 0x15a   :  { %1595 = vmatpush3.bf16.msra.mxu0 %v2004_v21 }
 0x15b   :  { %1596 = vmatprep.subr.bf16.mxu0 %v1881_v0 }
 0x15e   :  { %1598 = vmatpush3.bf16.msra.mxu0 %v2008_v28 }
 0x15f   :  { %1599 = vmatprep.subr.bf16.mxu0 %v1881_v0 }
 0x162   :  { %1601 = vmatpush3.bf16.msra.mxu0 %v2012_v34 }
 0x163   :  { %1602 = vmatprep.subr.bf16.mxu0 %v1881_v0 }
 0x166   :  { %1604 = vmatpush3.bf16.msra.mxu0 %v2016_v40 }
 0x167   :  { %1605 = vmatprep.subr.bf16.mxu0 %v1881_v0 }
 0x16a   :  { %1607 = vmatpush3.bf16.msra.mxu0 %v2020_v46 }
 0x16b   :  { %1608 = vmatprep.subr.bf16.mxu0 %v1881_v0 }
 0x16e   :  { %1610 = vmatpush3.bf16.msra.mxu0 %v2024_v50 }
 0x16f   :  { %1635 = vmatprep.subr.bf16.mxu0 %v1881_v0 }
 0x224   :  { %v385_v12 = vpop.f32.mrb[8].mxu0 }
 0x225   :  { %v389_v13 = vadd.f32 %v385_v12, %v187_v11  ;;  %v1237_v14 = vpop.f32.mrb[9].mxu0 }
 0x227   :  { %1743 = vtanh.f32 %v389_v13 }
 0x231   :  { %v1744_v16 = vpop.eup %1743 }
 0x232   :  { %1271 = vmatmul.mubr.f32.vlgmr.msra.gmra.mrb[2].mxu1 %v1744_v16 }
 0x233   :  { %1613 = vmatpush3.bf16.msra.mxu1 %v1997_v9  ;;  %1340 = vmatprep.mubr.msk.f32.mxu1 %vm1882_vm0, %v1883_v1 }
 0x234   :  { %1614 = vmatprep.subr.bf16.mxu1 %v1881_v0 }
 0x237   :  { %1616 = vmatpush3.bf16.msra.mxu1 %v2000_v15 }
 0x238   :  { %1617 = vmatprep.subr.bf16.mxu1 %v1881_v0 }
 0x23b   :  { %1619 = vmatpush3.bf16.msra.mxu1 %v2004_v21 }
 0x23c   :  { %1620 = vmatprep.subr.bf16.mxu1 %v1881_v0 }
 0x23f   :  { %1622 = vmatpush3.bf16.msra.mxu1 %v2008_v28 }
 0x240   :  { %1623 = vmatprep.subr.bf16.mxu1 %v1881_v0 }
 0x243   :  { %1625 = vmatpush3.bf16.msra.mxu1 %v2012_v34 }
 0x244   :  { %1626 = vmatprep.subr.bf16.mxu1 %v1881_v0 }
 0x247   :  { %1628 = vmatpush3.bf16.msra.mxu1 %v2016_v40 }
 0x248   :  { %1629 = vmatprep.subr.bf16.mxu1 %v1881_v0 }
 0x24b   :  { %1631 = vmatpush3.bf16.msra.mxu1 %v2020_v46 }
 0x24c   :  { %1632 = vmatprep.subr.bf16.mxu1 %v1881_v0 }
 0x24f   :  { %1634 = vmatpush3.bf16.msra.mxu1 %v2024_v50 }
 0x250   :  { %1659 = vmatprep.subr.bf16.mxu1 %v1881_v0 }
 0x305   :  { %v458_v18 = vpop.f32.mrb[2].mxu1 }
 0x306   :  { %v462_v19 = vadd.f32 %v458_v18, %v192_v17  ;;  %v1272_v20 = vpop.f32.mrb[3].mxu1 }
 0x308   :  { %1745 = vtanh.f32 %v462_v19 }
 0x312   :  { %v1746_v22 = vpop.eup %1745 }
 0x313   :  { %1306 = vmatmul.mubr.f32.vlgmr.msra.gmra.mrb[10].mxu0 %v1746_v22 }
 0x314   :  { %1637 = vmatpush3.bf16.msra.mxu0 %v1997_v9  ;;  %1375 = vmatprep.mubr.msk.f32.mxu0 %vm1882_vm0, %v1883_v1 }
 0x315   :  { %1638 = vmatprep.subr.bf16.mxu0 %v1881_v0 }
 0x318   :  { %1640 = vmatpush3.bf16.msra.mxu0 %v2000_v15 }
 0x319   :  { %1641 = vmatprep.subr.bf16.mxu0 %v1881_v0 }
 0x31c   :  { %1643 = vmatpush3.bf16.msra.mxu0 %v2004_v21 }
 0x31d   :  { %1644 = vmatprep.subr.bf16.mxu0 %v1881_v0 }
 0x320   :  { %1646 = vmatpush3.bf16.msra.mxu0 %v2008_v28 }
 0x321   :  { %1647 = vmatprep.subr.bf16.mxu0 %v1881_v0 }
 0x324   :  { %1649 = vmatpush3.bf16.msra.mxu0 %v2012_v34 }
 0x325   :  { %1650 = vmatprep.subr.bf16.mxu0 %v1881_v0 }
 0x328   :  { %1652 = vmatpush3.bf16.msra.mxu0 %v2016_v40 }
 0x329   :  { %1653 = vmatprep.subr.bf16.mxu0 %v1881_v0 }
 0x32c   :  { %1655 = vmatpush3.bf16.msra.mxu0 %v2020_v46 }
 0x32d   :  { %1656 = vmatprep.subr.bf16.mxu0 %v1881_v0 }
 0x330   :  { %1658 = vmatpush3.bf16.msra.mxu0 %v2024_v50 }
 0x331   :  { %1683 = vmatprep.subr.bf16.mxu0 %v1881_v0 }
 0x3e6   :  { %v531_v24 = vpop.f32.mrb[10].mxu0 }
 0x3e7   :  { %v535_v25 = vadd.f32 %v531_v24, %v197_v23  ;;  %v1307_v26 = vpop.f32.mrb[11].mxu0 }
 0x3e9   :  { %1747 = vtanh.f32 %v535_v25 }
 0x3f3   :  { %v1748_v27 = vpop.eup %1747 }
 0x3f4   :  { %1341 = vmatmul.mubr.f32.vlgmr.msra.gmra.mrb[4].mxu1 %v1748_v27 }
 0x3f5   :  { %1661 = vmatpush3.bf16.msra.mxu1 %v1997_v9  ;;  %1410 = vmatprep.mubr.msk.f32.mxu1 %vm1882_vm0, %v1883_v1 }
 0x3f6   :  { %1662 = vmatprep.subr.bf16.mxu1 %v1881_v0 }
 0x3f9   :  { %1664 = vmatpush3.bf16.msra.mxu1 %v2000_v15 }
 0x3fa   :  { %1665 = vmatprep.subr.bf16.mxu1 %v1881_v0 }
 0x3fd   :  { %1667 = vmatpush3.bf16.msra.mxu1 %v2004_v21 }
 0x3fe   :  { %1668 = vmatprep.subr.bf16.mxu1 %v1881_v0 }
 0x401   :  { %1670 = vmatpush3.bf16.msra.mxu1 %v2008_v28 }
 0x402   :  { %1671 = vmatprep.subr.bf16.mxu1 %v1881_v0 }
 0x405   :  { %1673 = vmatpush3.bf16.msra.mxu1 %v2012_v34 }
 0x406   :  { %1674 = vmatprep.subr.bf16.mxu1 %v1881_v0 }
 0x409   :  { %1676 = vmatpush3.bf16.msra.mxu1 %v2016_v40 }
 0x40a   :  { %1677 = vmatprep.subr.bf16.mxu1 %v1881_v0 }
 0x40d   :  { %1679 = vmatpush3.bf16.msra.mxu1 %v2020_v46 }
 0x40e   :  { %1680 = vmatprep.subr.bf16.mxu1 %v1881_v0 }
 0x411   :  { %1682 = vmatpush3.bf16.msra.mxu1 %v2024_v50 }
 0x412   :  { %1707 = vmatprep.subr.bf16.mxu1 %v1881_v0 }
 0x4c7   :  { %v604_v30 = vpop.f32.mrb[4].mxu1 }
 0x4c8   :  { %v608_v31 = vadd.f32 %v604_v30, %v202_v29  ;;  %v1342_v32 = vpop.f32.mrb[5].mxu1 }
 0x4ca   :  { %1749 = vtanh.f32 %v608_v31 }
 0x4d4   :  { %v1750_v33 = vpop.eup %1749 }
 0x4d5   :  { %1376 = vmatmul.mubr.f32.vlgmr.msra.gmra.mrb[12].mxu0 %v1750_v33 }
 0x4d6   :  { %1685 = vmatpush3.bf16.msra.mxu0 %v1997_v9  ;;  %1445 = vmatprep.mubr.msk.f32.mxu0 %vm1882_vm0, %v1883_v1  ;;  %v207_v9 = vadd.f32 %v2091_v6, %v2070_v58 }
 0x4d7   :  { %1686 = vmatprep.subr.bf16.mxu0 %v1881_v0 }
 0x4da   :  { %1688 = vmatpush3.bf16.msra.mxu0 %v2000_v15 }
 0x4db   :  { %1689 = vmatprep.subr.bf16.mxu0 %v1881_v0 }
 0x4de   :  { %1691 = vmatpush3.bf16.msra.mxu0 %v2004_v21 }
 0x4df   :  { %1692 = vmatprep.subr.bf16.mxu0 %v1881_v0 }
 0x4e2   :  { %1694 = vmatpush3.bf16.msra.mxu0 %v2008_v28 }
 0x4e3   :  { %1695 = vmatprep.subr.bf16.mxu0 %v1881_v0 }
 0x4e6   :  { %1697 = vmatpush3.bf16.msra.mxu0 %v2012_v34 }
 0x4e7   :  { %1698 = vmatprep.subr.bf16.mxu0 %v1881_v0 }
 0x4ea   :  { %1700 = vmatpush3.bf16.msra.mxu0 %v2016_v40  ;;  %v1711_v40 = vpack.c.bf16 %v837_v39, %v836_v37 }
 0x4eb   :  { %1701 = vmatprep.subr.bf16.mxu0 %v1881_v0 }
 0x4ee   :  { %1703 = vmatpush3.bf16.msra.mxu0 %v2020_v46  ;;  %v1717_v46 = vpack.c.bf16 %v841_v45, %v840_v44 }
 0x4ef   :  { %1704 = vmatprep.subr.bf16.mxu0 %v1881_v0 }
 0x4f2   :  { %1706 = vmatpush3.bf16.msra.mxu0 %v2024_v50 }
 0x5a8   :  { %v677_v15 = vpop.f32.mrb[12].mxu0 }
 0x5a9   :  { %v681_v21 = vadd.f32 %v677_v15, %v207_v9  ;;  %v1377_v28 = vpop.f32.mrb[13].mxu0 }
 0x5ab   :  { %1751 = vtanh.f32 %v681_v21 }
 0x5b5   :  { %v1752_v34 = vpop.eup %1751 }
 0x5b6   :  { %1411 = vmatmul.mubr.f32.vlgmr.msra.gmra.mrb[6].mxu1 %v1752_v34 }
 0x5b7   :  { %1480 = vmatprep.mubr.msk.f32.mxu1 %vm1882_vm0, %v1883_v1  ;;  %1709 = vmatpush3.bf16.msra.mxu1 %v1708_v38  ;;  %v842_v1 = vld [vmem:[#allocation10 + $0x40] sm:$0xff] }
 0x5b8   :  { %1710 = vmatprep.subr.bf16.mxu1 %v1881_v0  ;;  %v1720_v48 = vpack.c.bf16 %v843_v47, %v842_v1 }
 0x5bb   :  { %1712 = vmatpush3.bf16.msra.mxu1 %v1711_v40 }
 0x5bc   :  { %1713 = vmatprep.subr.bf16.mxu1 %v1881_v0 }
 0x5bf   :  { %1715 = vmatpush3.bf16.msra.mxu1 %v1714_v43 }
 0x5c0   :  { %1716 = vmatprep.subr.bf16.mxu1 %v1881_v0 }
 0x5c3   :  { %1718 = vmatpush3.bf16.msra.mxu1 %v1717_v46 }
 0x5c4   :  { %1719 = vmatprep.subr.bf16.mxu1 %v1881_v0 }
 0x5c7   :  { %1721 = vmatpush3.bf16.msra.mxu1 %v1720_v48 }
 0x5c8   :  { %1722 = vmatprep.subr.bf16.mxu1 %v1881_v0 }
 0x5cb   :  { %1724 = vmatpush3.bf16.msra.mxu1 %v1723_v56 }
 0x5cc   :  { %1725 = vmatprep.subr.bf16.mxu1 %v1881_v0 }
 0x5cf   :  { %1727 = vmatpush3.bf16.msra.mxu1 %v1726_v60 }
 0x5d0   :  { %1728 = vmatprep.subr.bf16.mxu1 %v1881_v0 }
 0x5d3   :  { %1730 = vmatpush3.bf16.msra.mxu1 %v1729_v63 }
 0x689   :  { %v750_v50 = vpop.f32.mrb[6].mxu1 }
 0x68a   :  { %v754_v51 = vadd.f32 %v750_v50, %v212_v49  ;;  %v1412_v52 = vpop.f32.mrb[7].mxu1 }
 0x68c   :  { %1753 = vtanh.f32 %v754_v51 }
 0x696   :  { %v1754_v53 = vpop.eup %1753 }
 0x697   :  { %1446 = vmatmul.mubr.f32.vlgmr.msra.gmra.mrb[14].mxu0 %v1754_v53 }
 0x76a   :  { %v823_v3 = vpop.f32.mrb[14].mxu0 }
 0x76b   :  { %v827_v4 = vadd.f32 %v823_v3, %v217_v2  ;;  %v1447_v5 = vpop.f32.mrb[15].mxu0 }
 0x76d   :  { %1755 = vtanh.f32 %v827_v4 }
 0x777   :  { %v1756_v6 = vpop.eup %1755 }
 0x778   :  { %1481 = vmatmul.mubr.f32.vlgmr.msra.gmra.mrb[8].mxu1 %v1756_v6 }
 0x84b   :  { %v923_v10 = vpop.f32.mrb[8].mxu1 }
 0x84c   :  { %v924_v11 = vadd.f32 %v946_v7, %v923_v10  ;;  %v1482_v12 = vpop.f32.mrb[9].mxu1 }
 0x84e   :  { %927 = vst [vmem:[#allocation12] sm:$0xff] %v924_v11 }
 0x84f   :  { %1856 = shalt.err (!%p1853_p8)
}
 0x850   :  { %s1857_s27 = scalar_lea.hbm %s2211_s6, 128 }
 0x851   :  { %p1858_p9 = scmp.ne.s32.totalorder %s2211_s6, %s1857_s27  ;;  %p1861_p10 = scmp.lt.u32.totalorder %s1857_s27, %s2211_s6 }
 0x853   :  { %p1863_p11 = pnand %p1861_p10, %p1858_p9 }
 0x855   :  { %1866 = shalt.err (!%p1863_p11)
}
 0x856   :  { %937 = dma.vmem_to_hbm [thread:$0]  %s935_s22, 128, %s2211_s6, [#allocation6]  }
 0x857   :  { %1873 = dma.done.wait [#allocation6], 128  }
 0x858   :  { %1874 = vsyncadd [#allocation6], 4294967168 }
 0x859   :  { %941 = vsyncpa [#allocation5], 1 }
 0x85a   :  { %942 = vsyncpa [#allocation8], 1 }
 0x85b   :  { %943 = vsyncpa [#allocation11], 1 }
 0x85c   :  { %944 = vsyncpa [#allocation6], 1 }

</bundles_post_ra>
